<compile_context>
chip_gen: v7x
topology: tpu7x:2x2x1
jax: 0.10.0
libtpu: 0.0.40
codegen_flags: <defaults>
</compile_context>

<pallas_src>
import jax
import jax.numpy as jnp
from jax.experimental import pallas as pl
from jax.experimental.pallas import tpu as pltpu


def linear_relu_kernel(x_ref, w_ref, b_ref, o_ref):
    # x_ref: (IN, TILE_B) VMEM   -- features on sublanes, batch on lanes
    # w_ref: (IN, 1)      VMEM   -- weight column, broadcast over lanes
    # b_ref: (1,)         SMEM   -- scalar bias
    # o_ref: (1, TILE_B)  VMEM   -- lane-dense output row
    prod = x_ref[...] * w_ref[...]                      # VPU mul (lane-broadcast w)
    y = jnp.sum(prod, axis=0, keepdims=True)            # XLU sublane reduce -> (1, TILE_B)
    y = y + b_ref[0]                                    # scalar-operand VPU add
    o_ref[...] = jnp.maximum(y, 0.0).astype(o_ref.dtype)


def classifier_forward(x, w, b, *, tile_b=512):
    """Forward pass of Classifier: relu(x @ w.T + b).

    x: (B, 7) f32
    w: (1, 7) f32   (PyTorch nn.Linear layout: (out_features, in_features))
    b: (1,)   f32
    returns: (B, 1) f32
    """
    B, IN = x.shape
    OUT = w.shape[0]
    assert w.shape == (OUT, IN) and b.shape == (OUT,) and OUT == 1

    lane = 128
    # Pad batch to a multiple of 128 lanes (and of tile_b) for lane-dense stores.
    b_pad = max(lane, -(-B // lane) * lane)
    tile_b = min(tile_b, b_pad)
    b_pad = -(-b_pad // tile_b) * tile_b

    # Batch-on-lanes layout: (IN, B_pad); padded columns are zeros (sliced off below).
    x_t = jnp.pad(x.T.astype(jnp.float32), ((0, 0), (0, b_pad - B)))
    w_col = w.T.astype(jnp.float32)          # (IN, 1)
    bias = b.astype(jnp.float32)             # (1,) scalar, lives in SMEM

    grid = (b_pad // tile_b,)

    out_row = pl.pallas_call(
        linear_relu_kernel,
        out_shape=jax.ShapeDtypeStruct((1, b_pad), jnp.float32),
        grid=grid,
        in_specs=[
            pl.BlockSpec((IN, tile_b), lambda i: (0, i)),      # x tile: batch grid
            pl.BlockSpec((IN, 1), lambda i: (0, 0)),           # weight: grid-invariant
            pl.BlockSpec(memory_space=pltpu.MemorySpace.SMEM), # scalar bias in SMEM
        ],
        out_specs=pl.BlockSpec((1, tile_b), lambda i: (0, i)),
        compiler_params=pltpu.CompilerParams(
            # Batch tiles are independent -> shard across v7x's 2 TensorCores.
            dimension_semantics=("parallel",),
        ),
        cost_estimate=pl.CostEstimate(
            flops=2 * b_pad * IN + 2 * b_pad,          # mul+add reduce, bias, relu
            transcendentals=0,
            bytes_accessed=4 * (IN * b_pad + IN + 1 + b_pad),
        ),
    )(x_t, w_col, bias)

    # De-pad and restore the (B, 1) PyTorch output layout.
    return out_row[0, :B][:, None]


if __name__ == "__main__":
    key = jax.random.PRNGKey(0)
    kx, kw, kb, kx2 = jax.random.split(key, 4)

    B, IN_F, OUT_F = 8, 7, 1

    # Deterministic params (mimics nn.Linear uniform(-1/sqrt(in), 1/sqrt(in)))
    bound = 1.0 / jnp.sqrt(jnp.float32(IN_F))
    w = jax.random.uniform(kw, (OUT_F, IN_F), jnp.float32, -bound, bound)
    b = jax.random.uniform(kb, (OUT_F,), jnp.float32, -bound, bound)

    # --- small batch (single tile, padded to 128 lanes) ---
    x = jax.random.normal(kx, (B, IN_F), jnp.float32)
    out = jax.block_until_ready(classifier_forward(x, w, b))
    ref = jnp.maximum(x @ w.T + b, 0.0)
    assert out.shape == (B, OUT_F)
    assert jnp.allclose(out, ref, atol=1e-5, rtol=1e-5)

    # --- larger, non-aligned batch (exercises padding + multi-tile grid) ---
    B2 = 300
    x2 = jax.random.normal(kx2, (B2, IN_F), jnp.float32)
    out2 = jax.block_until_ready(classifier_forward(x2, w, b, tile_b=128))
    ref2 = jnp.maximum(x2 @ w.T + b, 0.0)
    assert out2.shape == (B2, OUT_F)
    assert jnp.allclose(out2, ref2, atol=1e-5, rtol=1e-5)

    print("KERNEL_OK")
</pallas_src>

<mosaic_0001>
module attributes {stable_mosaic.version = 11 : i64} {
  func.func @linear_relu_kernel(%arg0: i32, %arg1: memref<7x128xf32, #tpu.memory_space<vmem>>, %arg2: memref<7x1xf32, #tpu.memory_space<vmem>>, %arg3: memref<1xf32, #tpu.memory_space<smem>>, %arg4: memref<1x128xf32, #tpu.memory_space<vmem>>) attributes {dimension_semantics = [#tpu.dimension_semantics<parallel>], iteration_bounds = array<i64: 1>, scalar_prefetch = 0 : i64, scratch_operands = 0 : i64, tpu.core_type = #tpu.core_type<tc>, window_params = [{transform_indices = @transform_0, window_bounds = array<i64: 7, 128>}, {pipeline_mode = #tpu.pipeline_mode<synchronous>, transform_indices = @transform_1, window_bounds = array<i64: 7, 1>}, {transform_indices = @transform_2, window_bounds = array<i64: 1>}, {transform_indices = @transform_3, window_bounds = array<i64: 1, 128>}]} {
    %c0 = arith.constant 0 : index
    %c0_0 = arith.constant 0 : index
    %0 = vector.load %arg1[%c0, %c0_0] : memref<7x128xf32, #tpu.memory_space<vmem>>, vector<7x128xf32>
    %c0_1 = arith.constant 0 : index
    %c0_2 = arith.constant 0 : index
    %1 = vector.load %arg2[%c0_1, %c0_2] : memref<7x1xf32, #tpu.memory_space<vmem>>, vector<7x1xf32>
    %2 = vector.broadcast %1 : vector<7x1xf32> to vector<7x128xf32>
    %3 = arith.mulf %0, %2 : vector<7x128xf32>
    %cst = arith.constant dense<0.000000e+00> : vector<128xf32>
    %4 = vector.multi_reduction <add>, %3, %cst [0] : vector<7x128xf32> to vector<128xf32>
    %5 = vector.shape_cast %4 : vector<128xf32> to vector<1x128xf32>
    %c0_3 = arith.constant 0 : index
    %6 = memref.load %arg3[%c0_3] : memref<1xf32, #tpu.memory_space<smem>>
    %7 = vector.broadcast %6 : f32 to vector<1x128xf32>
    %8 = arith.addf %5, %7 : vector<1x128xf32>
    %cst_4 = arith.constant 0.000000e+00 : f32
    %9 = vector.broadcast %cst_4 : f32 to vector<1x128xf32>
    %10 = arith.maximumf %8, %9 : vector<1x128xf32>
    %c0_5 = arith.constant 0 : index
    %c0_6 = arith.constant 0 : index
    %11 = vector.load %arg4[%c0_5, %c0_6] : memref<1x128xf32, #tpu.memory_space<vmem>>, vector<1x128xf32>
    tpu.vector_store %arg4[%c0_5, %c0_6], %10 {strides = array<i32>} : memref<1x128xf32, #tpu.memory_space<vmem>>, vector<1x128xf32>,
    return
  }
  func.func @transform_0(%arg0: i32) -> (i32, i32) {
    %c0_i32 = arith.constant 0 : i32
    %c0_i32_0 = arith.constant 0 : i32
    return %c0_i32, %arg0 : i32, i32
  }
  func.func @transform_1(%arg0: i32) -> (i32, i32) {
    %c0_i32 = arith.constant 0 : i32
    %c0_i32_0 = arith.constant 0 : i32
    %c0_i32_1 = arith.constant 0 : i32
    return %c0_i32, %c0_i32_0 : i32, i32
  }
  func.func @transform_2(%arg0: i32) -> i32 {
    %c0_i32 = arith.constant 0 : i32
    %c0_i32_0 = arith.constant 0 : i32
    return %c0_i32 : i32
  }
  func.func @transform_3(%arg0: i32) -> (i32, i32) {
    %c0_i32 = arith.constant 0 : i32
    %c0_i32_0 = arith.constant 0 : i32
    return %c0_i32, %arg0 : i32, i32
  }
}

</mosaic_0001>

<bundles_post_ra>
// kernel: tpu_custom_call.1
= control target key start
LH: loop header
LB: loop body
LE: loop exit
PB: predicated region body
PF: predicated region fallthrough
CT: control target
= control target key end

     0   :  { %s121_s0 = inlined_call_operand.vmem [shape: f32[7,128], index: 0, kind: input, shape index: {}]   ;;  %s122_s1 = inlined_call_operand.vmem [shape: f32[7,1], index: 1, kind: input, shape index: {}]   ;;  %s123_s2 = inlined_call_operand.<no memory space> [shape: f32[1], index: 2, kind: input, shape index: {}]   ;;  %s124_s3 = inlined_call_operand.hbm [shape: f32[1,128], index: 3, kind: output, shape index: {}]  }
   0x1   :  { %v17_v0 = vld [vmem:[%s122_s1] sm:$0x7f] }
   0x2   :  { %9 = vsyncpa [#allocation4], 0  ;;  %v78_v1 = vmov 0   ;;  %v16_v2 = vld [vmem:[%s121_s0] sm:$0x7f]  ;;  %vm24_vm0 = vcmask 1046528   ;;  %v33_v11 = vstv %s123_s2 }
   0x3   :  { %53 = vset.pattern.permute.xlu0 %v78_v1  ;;  %s79_s1 = smov [#allocation3]  }
   0x4   :  { %20 = vperm.xlu0 %53, %v17_v0   ;;  %s43_s18 = sshll.u32 %s79_s1, 4  ;;  %s44_s18 = int_to_ptr.vmem [resolvable:$true] %s43_s18 }
   0x5   :  { %s54_s0 = scalar_lea.vmem %s44_s18, 16  ;;  %s58_s19 = scalar_lea.vmem %s44_s18, 32 }
   0x6   :  { %p55_p0 = scmp.ne.s32.totalorder %s44_s18, %s54_s0  ;;  %p59_p1 = scmp.lt.s32.totalorder %s44_s18, %s44_s18 }
   0x7   :  { %p60_p2 = scmp.lt.s32.totalorder %s58_s19, %s54_s0 }
   0x9   :  { %p61_p3 = por %p60_p2, %p59_p1 }
   0xb   :  { %p62_p4 = pnand %p61_p3, %p55_p0 }
  0x83   :  { %v21_v3 = vpop.permute.xlu0 %20 }
  0x84   :  { %v23_v4 = vmul.f32 %v21_v3, %v16_v2 }
  0x86   :  { %v25_v5 = vsel %vm24_vm0, %v23_v4, 0.0 }
  0x87   :  { %v26_v6 = vrot.slane %v25_v5, 4 }
  0x89   :  { %v27_v7 = vadd.f32 %v26_v6, %v25_v5 }
  0x8b   :  { %v28_v8 = vrot.slane %v27_v7, 2 }
  0x8d   :  { %v29_v9 = vadd.f32 %v28_v8, %v27_v7 }
  0x8f   :  { %v30_v10 = vrot.slane %v29_v9, 1 }
  0x91   :  { %v31_v12 = vadd.f32 %v30_v10, %v29_v9 }
  0x93   :  { %v34_v13 = vadd.f32 %v33_v11, %v31_v12 }
  0x95   :  { %v35_v14 = vmax.f32 %v34_v13, 0.0 }
  0x97   :  { %36 = vst [vmem:[#allocation3] sm:$0x1] %v35_v14 }
  0x98   :  { %65 = shalt.err (!%p62_p4)
}
  0x99   :  { %s66_s22 = scalar_lea.hbm %s124_s3, 16 }
  0x9a   :  { %p67_p5 = scmp.ne.s32.totalorder %s124_s3, %s66_s22  ;;  %p70_p6 = scmp.lt.u32.totalorder %s66_s22, %s124_s3 }
  0x9c   :  { %p72_p7 = pnand %p70_p6, %p67_p5 }
  0x9e   :  { %75 = shalt.err (!%p72_p7)
}
  0x9f   :  { %46 = dma.vmem_to_hbm [thread:$0]  %s44_s18, 16, %s124_s3, [#allocation4]  }
  0xa0   :  { %76 = dma.done.wait [#allocation4], 16  }
  0xa1   :  { %77 = vsyncadd [#allocation4], 4294967280 }
  0xa2   :  { %50 = vsyncpa [#allocation4], 1 }

</bundles_post_ra>
